<compile_context>
chip_gen: v5e
topology: v5e:2x2
jax: 0.10.0
libtpu: 0.0.40
codegen_flags: <defaults>
</compile_context>

<pallas_src>
import math
import functools

import jax
import jax.numpy as jnp
from jax.experimental import pallas as pl
from jax.experimental.pallas import tpu as pltpu

BN_EPS = 1e-5


# ----------------------------- kernel ---------------------------------------
def _vae_kernel(x_ref, eps_ref, p_ref, out_ref, *,
                input_dim, hidden_dim, latent_dim):
    H, L, I = hidden_dim, latent_dim, input_dim

    # static row offsets into the single packed parameter slab
    o_w1 = 0
    o_r1a = o_w1 + I
    o_r1b = o_r1a + H
    o_w3 = o_r1b + H
    o_r2a = o_w3 + L
    o_r2b = o_r2a + H
    o_head = o_r2b + H            # fc21|fc22|fc4 lane-stacked, H rows, 2L+I lanes
    o_vec = o_head + H            # 16 row-stacked (1, *) bias / BN-param rows

    def wmat(off, rows):
        return p_ref[off:off + rows, 0:H]                  # [rows, H] static view

    def vrow(idx, width):
        return p_ref[o_vec + idx:o_vec + idx + 1, 0:width]  # (1, width) static view

    def linear(h, w, b):
        return jnp.dot(h, w, preferred_element_type=jnp.float32) + b

    def batchnorm(h, gamma, beta):
        # single-pass batch stats; normalization folds into one FMA on h.
        inv_n = 1.0 / h.shape[0]
        s1 = jnp.sum(h, axis=0, keepdims=True)
        s2 = jnp.sum(h * h, axis=0, keepdims=True)
        mean = s1 * inv_n
        var = jnp.maximum(s2 * inv_n - mean * mean, 0.0)
        scale = gamma * jax.lax.rsqrt(var + BN_EPS)
        shift = beta - mean * scale
        return h * scale + shift

    def resblock(h, wa_off, wb_off, vbase):
        out = linear(h, wmat(wa_off, H), vrow(vbase + 0, H))
        out = jnp.maximum(batchnorm(out, vrow(vbase + 1, H), vrow(vbase + 2, H)), 0.0)
        out = linear(out, wmat(wb_off, H), vrow(vbase + 3, H))
        out = batchnorm(out, vrow(vbase + 4, H), vrow(vbase + 5, H))
        return jnp.maximum(out + h, 0.0)

    x = x_ref[...]
    eps = eps_ref[...]

    # ---- encode ----
    h = linear(x, wmat(o_w1, I), vrow(0, H))
    h = resblock(h, o_r1a, o_r1b, 1)

    # fused fc21|fc22 head: one matmul producing [B, 2L] = [mu | logvar]
    mulv = linear(h, p_ref[o_head:o_head + H, 0:2 * L], vrow(7, 2 * L))

    # ---- reparameterize ----
    # exp on the full [B, 2L] tile first so the EUP exp overlaps the XLU
    # lane-shift of the mu/logvar split instead of serializing behind it.
    e = jnp.exp(0.5 * mulv)
    z = mulv[:, :L] + eps * e[:, L:2 * L]

    # ---- decode ----
    d = linear(z, wmat(o_w3, L), vrow(8, H))
    d = resblock(d, o_r2a, o_r2b, 9)
    recon = linear(d, p_ref[o_head:o_head + H, 2 * L:2 * L + I], vrow(15, I))

    # ---- packed lane-dense output [recon | mu | logvar], two sliced stores ----
    out_ref[:, 0:I] = recon.astype(out_ref.dtype)
    out_ref[:, I:I + 2 * L] = mulv.astype(out_ref.dtype)


# ----------------------------- wrapper ---------------------------------------
def vae_forward(x, eps, param_slab, *, hidden_dim, latent_dim, block_batch=None):
    """Run the VAE forward. `param_slab` comes from pack_vae_params.

    block_batch defaults to the full batch so BatchNorm uses full-batch
    statistics (exact PyTorch training-mode semantics).
    """
    B, I = x.shape
    H, L = hidden_dim, latent_dim
    TB = B if block_batch is None else block_batch
    # TODO(synk): block_batch < B switches BatchNorm to per-tile ("ghost") stats;
    #             exact full-batch BN across tiles would need a two-phase
    #             cross-tile reduction, which this micro-kernel does not implement.
    num_tiles = pl.cdiv(B, TB)

    kernel = functools.partial(
        _vae_kernel, input_dim=I, hidden_dim=H, latent_dim=L)

    # advisory cost estimate so XLA can schedule/overlap this micro-kernel well
    flops = 2 * B * (I * H + 4 * H * H + H * (2 * L) + L * H + H * I)
    transcendentals = B * 2 * L + 4 * H
    bytes_accessed = 4 * (x.size + eps.size + param_slab.size + B * (I + 2 * L))

    packed_out = pl.pallas_call(
        kernel,
        out_shape=jax.ShapeDtypeStruct((B, I + 2 * L), jnp.float32),
        grid=(num_tiles,),
        in_specs=[
            pl.BlockSpec((TB, I), lambda b: (b, 0)),
            pl.BlockSpec((TB, L), lambda b: (b, 0)),
            # parameters: single slab, same block for every tile -> VMEM-resident
            pl.BlockSpec(param_slab.shape, lambda b: (0, 0)),
        ],
        out_specs=pl.BlockSpec((TB, I + 2 * L), lambda b: (b, 0)),
        compiler_params=pltpu.CompilerParams(
            dimension_semantics=("parallel",)),
        cost_estimate=pl.CostEstimate(
            flops=flops,
            transcendentals=transcendentals,
            bytes_accessed=bytes_accessed),
    )(x, eps, param_slab)

    recon = packed_out[:, :I]
    mu = packed_out[:, I:I + L]
    logvar = packed_out[:, I + L:]
    return recon, mu, logvar


# ----------------------------- parameter init --------------------------------
def _linear_params(key, fan_in, fan_out):
    """PyTorch nn.Linear default init: U(-1/sqrt(fan_in), 1/sqrt(fan_in))."""
    k = 1.0 / math.sqrt(fan_in)
    kw, kb = jax.random.split(key)
    w = jax.random.uniform(kw, (fan_in, fan_out), jnp.float32, -k, k)
    b = jax.random.uniform(kb, (1, fan_out), jnp.float32, -k, k)
    return w, b


def _bn_params(dim):
    return jnp.ones((1, dim), jnp.float32), jnp.zeros((1, dim), jnp.float32)


def make_vae_params(key, input_dim, hidden_dim, latent_dim):
    keys = jax.random.split(key, 16)
    params = []
    # fc1
    params += _linear_params(keys[0], input_dim, hidden_dim)
    # res1: fc1, bn1, fc2, bn2
    params += _linear_params(keys[1], hidden_dim, hidden_dim)
    params += _bn_params(hidden_dim)
    params += _linear_params(keys[2], hidden_dim, hidden_dim)
    params += _bn_params(hidden_dim)
    # fc21, fc22
    params += _linear_params(keys[3], hidden_dim, latent_dim)
    params += _linear_params(keys[4], hidden_dim, latent_dim)
    # fc3
    params += _linear_params(keys[5], latent_dim, hidden_dim)
    # res2: fc1, bn1, fc2, bn2
    params += _linear_params(keys[6], hidden_dim, hidden_dim)
    params += _bn_params(hidden_dim)
    params += _linear_params(keys[7], hidden_dim, hidden_dim)
    params += _bn_params(hidden_dim)
    # fc4
    params += _linear_params(keys[8], hidden_dim, input_dim)
    return params


def pack_vae_params(params, input_dim, hidden_dim, latent_dim):
    """Pack all 26 small arrays into ONE contiguous [rows, W] slab."""
    (w1, b1,
     r1_wa, r1_ba, r1_ga, r1_bea, r1_wb, r1_bb, r1_gb, r1_beb,
     w21, b21, w22, b22,
     w3, b3,
     r2_wa, r2_ba, r2_ga, r2_bea, r2_wb, r2_bb, r2_gb, r2_beb,
     w4, b4) = params

    H, L, I = hidden_dim, latent_dim, input_dim
    W = max(H, 2 * L + I)

    def pad(a):
        return jnp.pad(a, ((0, 0), (0, W - a.shape[1])))

    head = jnp.concatenate([w21, w22, w4], axis=1)        # [H, 2L+I]
    b_head = jnp.concatenate([b21, b22], axis=1)          # [1, 2L]

    rows = [
        # segment A: every weight whose out_features == hidden, row-stacked
        w1, r1_wa, r1_wb, w3, r2_wa, r2_wb,               # [I+4H+L, H]
        # segment B: fused head weights (fc21|fc22|fc4)
        head,                                             # [H, 2L+I]
        # segment C: 16 bias / BN-parameter rows
        b1,
        r1_ba, r1_ga, r1_bea, r1_bb, r1_gb, r1_beb,
        b_head,
        b3,
        r2_ba, r2_ga, r2_bea, r2_bb, r2_gb, r2_beb,
        b4,
    ]
    slab = jnp.concatenate([pad(r) for r in rows], axis=0)  # [I+5H+L+16, W]
    return slab


# ----------------------------- reference (plain JAX) --------------------------
def vae_reference(x, eps, params):
    (w1, b1,
     r1_wa, r1_ba, r1_ga, r1_bea, r1_wb, r1_bb, r1_gb, r1_beb,
     w21, b21, w22, b22,
     w3, b3,
     r2_wa, r2_ba, r2_ga, r2_bea, r2_wb, r2_bb, r2_gb, r2_beb,
     w4, b4) = params

    def linear(h, w, b):
        return h @ w + b

    def bn(h, g, be):
        m = jnp.mean(h, axis=0, keepdims=True)
        v = jnp.mean(jnp.square(h - m), axis=0, keepdims=True)
        return (h - m) / jnp.sqrt(v + BN_EPS) * g + be

    def res(h, wa, ba, ga, bea, wb, bb, gb, beb):
        out = jnp.maximum(bn(linear(h, wa, ba), ga, bea), 0.0)
        out = bn(linear(out, wb, bb), gb, beb)
        return jnp.maximum(out + h, 0.0)

    h = linear(x, w1, b1)
    h = res(h, r1_wa, r1_ba, r1_ga, r1_bea, r1_wb, r1_bb, r1_gb, r1_beb)
    mu = linear(h, w21, b21)
    logvar = linear(h, w22, b22)
    z = mu + eps * jnp.exp(0.5 * logvar)
    d = linear(z, w3, b3)
    d = res(d, r2_wa, r2_ba, r2_ga, r2_bea, r2_wb, r2_bb, r2_gb, r2_beb)
    recon = linear(d, w4, b4)
    return recon, mu, logvar


# ----------------------------- main -------------------------------------------
if __name__ == "__main__":
    B, INPUT_DIM, HIDDEN_DIM, LATENT_DIM = 8, 16, 32, 8

    key = jax.random.PRNGKey(0)
    k_x, k_eps, k_p = jax.random.split(key, 3)

    x = jax.random.normal(k_x, (B, INPUT_DIM), jnp.float32)
    # torch.randn_like(std) equivalent -> standard normal noise, generated host-side
    eps = jax.random.normal(k_eps, (B, LATENT_DIM), jnp.float32)

    params = make_vae_params(k_p, INPUT_DIM, HIDDEN_DIM, LATENT_DIM)
    param_slab = pack_vae_params(params, INPUT_DIM, HIDDEN_DIM, LATENT_DIM)

    recon, mu, logvar = vae_forward(
        x, eps, param_slab, hidden_dim=HIDDEN_DIM, latent_dim=LATENT_DIM)
    jax.block_until_ready((recon, mu, logvar))

    # sanity check against plain-JAX reference (unpacked params, two-pass BN)
    ref_recon, ref_mu, ref_logvar = vae_reference(x, eps, params)
    assert jnp.allclose(recon, ref_recon, atol=1e-4, rtol=1e-4)
    assert jnp.allclose(mu, ref_mu, atol=1e-4, rtol=1e-4)
    assert jnp.allclose(logvar, ref_logvar, atol=1e-4, rtol=1e-4)

    print("KERNEL_OK")
</pallas_src>

<mosaic_0001>
module attributes {stable_mosaic.version = 11 : i64} {
  func.func @_vae_kernel(%arg0: i32, %arg1: memref<8x16xf32, #tpu.memory_space<vmem>>, %arg2: memref<8x8xf32, #tpu.memory_space<vmem>>, %arg3: memref<200x32xf32, #tpu.memory_space<vmem>>, %arg4: memref<8x32xf32, #tpu.memory_space<vmem>>) attributes {dimension_semantics = [#tpu.dimension_semantics<parallel>], iteration_bounds = array<i64: 1>, scalar_prefetch = 0 : i64, scratch_operands = 0 : i64, tpu.core_type = #tpu.core_type<tc>, window_params = [{transform_indices = @transform_0, window_bounds = array<i64: 8, 16>}, {transform_indices = @transform_1, window_bounds = array<i64: 8, 8>}, {pipeline_mode = #tpu.pipeline_mode<synchronous>, transform_indices = @transform_2, window_bounds = array<i64: 200, 32>}, {transform_indices = @transform_3, window_bounds = array<i64: 8, 32>}]} {
    %c0 = arith.constant 0 : index
    %c0_0 = arith.constant 0 : index
    %0 = vector.load %arg1[%c0, %c0_0] : memref<8x16xf32, #tpu.memory_space<vmem>>, vector<8x16xf32>
    %c0_1 = arith.constant 0 : index
    %c0_2 = arith.constant 0 : index
    %1 = vector.load %arg2[%c0_1, %c0_2] : memref<8x8xf32, #tpu.memory_space<vmem>>, vector<8x8xf32>
    %c0_3 = arith.constant 0 : index
    %c0_4 = arith.constant 0 : index
    %2 = vector.load %arg3[%c0_3, %c0_4] : memref<200x32xf32, #tpu.memory_space<vmem>>, vector<16x32xf32>
    %c184 = arith.constant 184 : index
    %c0_5 = arith.constant 0 : index
    %3 = vector.load %arg3[%c184, %c0_5] : memref<200x32xf32, #tpu.memory_space<vmem>>, vector<1x32xf32>
    %cst = arith.constant dense<0.000000e+00> : vector<8x32xf32>
    %4 = tpu.matmul %0, %2, %cst {dimension_numbers = #tpu.dot_dimension_numbers<[1], [0], [0], [1], [0, 0, 1, 1], [], []>} : vector<8x16xf32>, vector<16x32xf32>, vector<8x32xf32> -> vector<8x32xf32>
    %5 = vector.broadcast %3 : vector<1x32xf32> to vector<8x32xf32>
    %6 = arith.addf %4, %5 : vector<8x32xf32>
    %c16 = arith.constant 16 : index
    %c0_6 = arith.constant 0 : index
    %7 = vector.load %arg3[%c16, %c0_6] : memref<200x32xf32, #tpu.memory_space<vmem>>, vector<32x32xf32>
    %c185 = arith.constant 185 : index
    %c0_7 = arith.constant 0 : index
    %8 = vector.load %arg3[%c185, %c0_7] : memref<200x32xf32, #tpu.memory_space<vmem>>, vector<1x32xf32>
    %cst_8 = arith.constant dense<0.000000e+00> : vector<8x32xf32>
    %9 = tpu.matmul %6, %7, %cst_8 {dimension_numbers = #tpu.dot_dimension_numbers<[1], [0], [0], [1], [0, 0, 1, 1], [], []>} : vector<8x32xf32>, vector<32x32xf32>, vector<8x32xf32> -> vector<8x32xf32>
    %10 = vector.broadcast %8 : vector<1x32xf32> to vector<8x32xf32>
    %11 = arith.addf %9, %10 : vector<8x32xf32>
    %c186 = arith.constant 186 : index
    %c0_9 = arith.constant 0 : index
    %12 = vector.load %arg3[%c186, %c0_9] : memref<200x32xf32, #tpu.memory_space<vmem>>, vector<1x32xf32>
    %c187 = arith.constant 187 : index
    %c0_10 = arith.constant 0 : index
    %13 = vector.load %arg3[%c187, %c0_10] : memref<200x32xf32, #tpu.memory_space<vmem>>, vector<1x32xf32>
    %cst_11 = arith.constant dense<0.000000e+00> : vector<32xf32>
    %14 = vector.multi_reduction <add>, %11, %cst_11 [0] : vector<8x32xf32> to vector<32xf32>
    %15 = vector.shape_cast %14 : vector<32xf32> to vector<1x32xf32>
    %16 = arith.mulf %11, %11 : vector<8x32xf32>
    %cst_12 = arith.constant dense<0.000000e+00> : vector<32xf32>
    %17 = vector.multi_reduction <add>, %16, %cst_12 [0] : vector<8x32xf32> to vector<32xf32>
    %18 = vector.shape_cast %17 : vector<32xf32> to vector<1x32xf32>
    %cst_13 = arith.constant 1.250000e-01 : f32
    %19 = vector.broadcast %cst_13 : f32 to vector<1x32xf32>
    %20 = arith.mulf %15, %19 : vector<1x32xf32>
    %cst_14 = arith.constant 1.250000e-01 : f32
    %21 = vector.broadcast %cst_14 : f32 to vector<1x32xf32>
    %22 = arith.mulf %18, %21 : vector<1x32xf32>
    %23 = arith.mulf %20, %20 : vector<1x32xf32>
    %24 = arith.subf %22, %23 : vector<1x32xf32>
    %cst_15 = arith.constant 0.000000e+00 : f32
    %25 = vector.broadcast %cst_15 : f32 to vector<1x32xf32>
    %26 = arith.maximumf %24, %25 : vector<1x32xf32>
    %cst_16 = arith.constant 9.99999974E-6 : f32
    %27 = vector.broadcast %cst_16 : f32 to vector<1x32xf32>
    %28 = arith.addf %26, %27 : vector<1x32xf32>
    %29 = math.rsqrt %28 : vector<1x32xf32>
    %30 = arith.mulf %12, %29 : vector<1x32xf32>
    %31 = arith.mulf %20, %30 : vector<1x32xf32>
    %32 = arith.subf %13, %31 : vector<1x32xf32>
    %33 = vector.broadcast %30 : vector<1x32xf32> to vector<8x32xf32>
    %34 = arith.mulf %11, %33 : vector<8x32xf32>
    %35 = vector.broadcast %32 : vector<1x32xf32> to vector<8x32xf32>
    %36 = arith.addf %34, %35 : vector<8x32xf32>
    %cst_17 = arith.constant 0.000000e+00 : f32
    %37 = vector.broadcast %cst_17 : f32 to vector<8x32xf32>
    %38 = arith.maximumf %36, %37 : vector<8x32xf32>
    %c48 = arith.constant 48 : index
    %c0_18 = arith.constant 0 : index
    %39 = vector.load %arg3[%c48, %c0_18] : memref<200x32xf32, #tpu.memory_space<vmem>>, vector<32x32xf32>
    %c188 = arith.constant 188 : index
    %c0_19 = arith.constant 0 : index
    %40 = vector.load %arg3[%c188, %c0_19] : memref<200x32xf32, #tpu.memory_space<vmem>>, vector<1x32xf32>
    %cst_20 = arith.constant dense<0.000000e+00> : vector<8x32xf32>
    %41 = tpu.matmul %38, %39, %cst_20 {dimension_numbers = #tpu.dot_dimension_numbers<[1], [0], [0], [1], [0, 0, 1, 1], [], []>} : vector<8x32xf32>, vector<32x32xf32>, vector<8x32xf32> -> vector<8x32xf32>
    %42 = vector.broadcast %40 : vector<1x32xf32> to vector<8x32xf32>
    %43 = arith.addf %41, %42 : vector<8x32xf32>
    %c189 = arith.constant 189 : index
    %c0_21 = arith.constant 0 : index
    %44 = vector.load %arg3[%c189, %c0_21] : memref<200x32xf32, #tpu.memory_space<vmem>>, vector<1x32xf32>
    %c190 = arith.constant 190 : index
    %c0_22 = arith.constant 0 : index
    %45 = vector.load %arg3[%c190, %c0_22] : memref<200x32xf32, #tpu.memory_space<vmem>>, vector<1x32xf32>
    %cst_23 = arith.constant dense<0.000000e+00> : vector<32xf32>
    %46 = vector.multi_reduction <add>, %43, %cst_23 [0] : vector<8x32xf32> to vector<32xf32>
    %47 = vector.shape_cast %46 : vector<32xf32> to vector<1x32xf32>
    %48 = arith.mulf %43, %43 : vector<8x32xf32>
    %cst_24 = arith.constant dense<0.000000e+00> : vector<32xf32>
    %49 = vector.multi_reduction <add>, %48, %cst_24 [0] : vector<8x32xf32> to vector<32xf32>
    %50 = vector.shape_cast %49 : vector<32xf32> to vector<1x32xf32>
    %cst_25 = arith.constant 1.250000e-01 : f32
    %51 = vector.broadcast %cst_25 : f32 to vector<1x32xf32>
    %52 = arith.mulf %47, %51 : vector<1x32xf32>
    %cst_26 = arith.constant 1.250000e-01 : f32
    %53 = vector.broadcast %cst_26 : f32 to vector<1x32xf32>
    %54 = arith.mulf %50, %53 : vector<1x32xf32>
    %55 = arith.mulf %52, %52 : vector<1x32xf32>
    %56 = arith.subf %54, %55 : vector<1x32xf32>
    %cst_27 = arith.constant 0.000000e+00 : f32
    %57 = vector.broadcast %cst_27 : f32 to vector<1x32xf32>
    %58 = arith.maximumf %56, %57 : vector<1x32xf32>
    %cst_28 = arith.constant 9.99999974E-6 : f32
    %59 = vector.broadcast %cst_28 : f32 to vector<1x32xf32>
    %60 = arith.addf %58, %59 : vector<1x32xf32>
    %61 = math.rsqrt %60 : vector<1x32xf32>
    %62 = arith.mulf %44, %61 : vector<1x32xf32>
    %63 = arith.mulf %52, %62 : vector<1x32xf32>
    %64 = arith.subf %45, %63 : vector<1x32xf32>
    %65 = vector.broadcast %62 : vector<1x32xf32> to vector<8x32xf32>
    %66 = arith.mulf %43, %65 : vector<8x32xf32>
    %67 = vector.broadcast %64 : vector<1x32xf32> to vector<8x32xf32>
    %68 = arith.addf %66, %67 : vector<8x32xf32>
    %69 = arith.addf %68, %6 : vector<8x32xf32>
    %cst_29 = arith.constant 0.000000e+00 : f32
    %70 = vector.broadcast %cst_29 : f32 to vector<8x32xf32>
    %71 = arith.maximumf %69, %70 : vector<8x32xf32>
    %c152 = arith.constant 152 : index
    %c0_30 = arith.constant 0 : index
    %72 = vector.load %arg3[%c152, %c0_30] : memref<200x32xf32, #tpu.memory_space<vmem>>, vector<32x16xf32>
    %c191 = arith.constant 191 : index
    %c0_31 = arith.constant 0 : index
    %73 = vector.load %arg3[%c191, %c0_31] : memref<200x32xf32, #tpu.memory_space<vmem>>, vector<1x16xf32>
    %cst_32 = arith.constant dense<0.000000e+00> : vector<8x16xf32>
    %74 = tpu.matmul %71, %72, %cst_32 {dimension_numbers = #tpu.dot_dimension_numbers<[1], [0], [0], [1], [0, 0, 1, 1], [], []>} : vector<8x32xf32>, vector<32x16xf32>, vector<8x16xf32> -> vector<8x16xf32>
    %75 = vector.broadcast %73 : vector<1x16xf32> to vector<8x16xf32>
    %76 = arith.addf %74, %75 : vector<8x16xf32>
    %cst_33 = arith.constant 5.000000e-01 : f32
    %77 = vector.broadcast %cst_33 : f32 to vector<8x16xf32>
    %78 = arith.mulf %77, %76 : vector<8x16xf32>
    %79 = math.exp %78 : vector<8x16xf32>
    %80 = vector.extract_strided_slice %76 {offsets = [0, 0], sizes = [8, 8], strides = [1, 1]} : vector<8x16xf32> to vector<8x8xf32>
    %81 = vector.extract_strided_slice %79 {offsets = [0, 8], sizes = [8, 8], strides = [1, 1]} : vector<8x16xf32> to vector<8x8xf32>
    %82 = arith.mulf %1, %81 : vector<8x8xf32>
    %83 = arith.addf %80, %82 : vector<8x8xf32>
    %c80 = arith.constant 80 : index
    %c0_34 = arith.constant 0 : index
    %84 = vector.load %arg3[%c80, %c0_34] : memref<200x32xf32, #tpu.memory_space<vmem>>, vector<8x32xf32>
    %c192 = arith.constant 192 : index
    %c0_35 = arith.constant 0 : index
    %85 = vector.load %arg3[%c192, %c0_35] : memref<200x32xf32, #tpu.memory_space<vmem>>, vector<1x32xf32>
    %cst_36 = arith.constant dense<0.000000e+00> : vector<8x32xf32>
    %86 = tpu.matmul %83, %84, %cst_36 {dimension_numbers = #tpu.dot_dimension_numbers<[1], [0], [0], [1], [0, 0, 1, 1], [], []>} : vector<8x8xf32>, vector<8x32xf32>, vector<8x32xf32> -> vector<8x32xf32>
    %87 = vector.broadcast %85 : vector<1x32xf32> to vector<8x32xf32>
    %88 = arith.addf %86, %87 : vector<8x32xf32>
    %c88 = arith.constant 88 : index
    %c0_37 = arith.constant 0 : index
    %89 = vector.load %arg3[%c88, %c0_37] : memref<200x32xf32, #tpu.memory_space<vmem>>, vector<32x32xf32>
    %c193 = arith.constant 193 : index
    %c0_38 = arith.constant 0 : index
    %90 = vector.load %arg3[%c193, %c0_38] : memref<200x32xf32, #tpu.memory_space<vmem>>, vector<1x32xf32>
    %cst_39 = arith.constant dense<0.000000e+00> : vector<8x32xf32>
    %91 = tpu.matmul %88, %89, %cst_39 {dimension_numbers = #tpu.dot_dimension_numbers<[1], [0], [0], [1], [0, 0, 1, 1], [], []>} : vector<8x32xf32>, vector<32x32xf32>, vector<8x32xf32> -> vector<8x32xf32>
    %92 = vector.broadcast %90 : vector<1x32xf32> to vector<8x32xf32>
    %93 = arith.addf %91, %92 : vector<8x32xf32>
    %c194 = arith.constant 194 : index
    %c0_40 = arith.constant 0 : index
    %94 = vector.load %arg3[%c194, %c0_40] : memref<200x32xf32, #tpu.memory_space<vmem>>, vector<1x32xf32>
    %c195 = arith.constant 195 : index
    %c0_41 = arith.constant 0 : index
    %95 = vector.load %arg3[%c195, %c0_41] : memref<200x32xf32, #tpu.memory_space<vmem>>, vector<1x32xf32>
    %cst_42 = arith.constant dense<0.000000e+00> : vector<32xf32>
    %96 = vector.multi_reduction <add>, %93, %cst_42 [0] : vector<8x32xf32> to vector<32xf32>
    %97 = vector.shape_cast %96 : vector<32xf32> to vector<1x32xf32>
    %98 = arith.mulf %93, %93 : vector<8x32xf32>
    %cst_43 = arith.constant dense<0.000000e+00> : vector<32xf32>
    %99 = vector.multi_reduction <add>, %98, %cst_43 [0] : vector<8x32xf32> to vector<32xf32>
    %100 = vector.shape_cast %99 : vector<32xf32> to vector<1x32xf32>
    %cst_44 = arith.constant 1.250000e-01 : f32
    %101 = vector.broadcast %cst_44 : f32 to vector<1x32xf32>
    %102 = arith.mulf %97, %101 : vector<1x32xf32>
    %cst_45 = arith.constant 1.250000e-01 : f32
    %103 = vector.broadcast %cst_45 : f32 to vector<1x32xf32>
    %104 = arith.mulf %100, %103 : vector<1x32xf32>
    %105 = arith.mulf %102, %102 : vector<1x32xf32>
    %106 = arith.subf %104, %105 : vector<1x32xf32>
    %cst_46 = arith.constant 0.000000e+00 : f32
    %107 = vector.broadcast %cst_46 : f32 to vector<1x32xf32>
    %108 = arith.maximumf %106, %107 : vector<1x32xf32>
    %cst_47 = arith.constant 9.99999974E-6 : f32
    %109 = vector.broadcast %cst_47 : f32 to vector<1x32xf32>
    %110 = arith.addf %108, %109 : vector<1x32xf32>
    %111 = math.rsqrt %110 : vector<1x32xf32>
    %112 = arith.mulf %94, %111 : vector<1x32xf32>
    %113 = arith.mulf %102, %112 : vector<1x32xf32>
    %114 = arith.subf %95, %113 : vector<1x32xf32>
    %115 = vector.broadcast %112 : vector<1x32xf32> to vector<8x32xf32>
    %116 = arith.mulf %93, %115 : vector<8x32xf32>
    %117 = vector.broadcast %114 : vector<1x32xf32> to vector<8x32xf32>
    %118 = arith.addf %116, %117 : vector<8x32xf32>
    %cst_48 = arith.constant 0.000000e+00 : f32
    %119 = vector.broadcast %cst_48 : f32 to vector<8x32xf32>
    %120 = arith.maximumf %118, %119 : vector<8x32xf32>
    %c120 = arith.constant 120 : index
    %c0_49 = arith.constant 0 : index
    %121 = vector.load %arg3[%c120, %c0_49] : memref<200x32xf32, #tpu.memory_space<vmem>>, vector<32x32xf32>
    %c196 = arith.constant 196 : index
    %c0_50 = arith.constant 0 : index
    %122 = vector.load %arg3[%c196, %c0_50] : memref<200x32xf32, #tpu.memory_space<vmem>>, vector<1x32xf32>
    %cst_51 = arith.constant dense<0.000000e+00> : vector<8x32xf32>
    %123 = tpu.matmul %120, %121, %cst_51 {dimension_numbers = #tpu.dot_dimension_numbers<[1], [0], [0], [1], [0, 0, 1, 1], [], []>} : vector<8x32xf32>, vector<32x32xf32>, vector<8x32xf32> -> vector<8x32xf32>
    %124 = vector.broadcast %122 : vector<1x32xf32> to vector<8x32xf32>
    %125 = arith.addf %123, %124 : vector<8x32xf32>
    %c197 = arith.constant 197 : index
    %c0_52 = arith.constant 0 : index
    %126 = vector.load %arg3[%c197, %c0_52] : memref<200x32xf32, #tpu.memory_space<vmem>>, vector<1x32xf32>
    %c198 = arith.constant 198 : index
    %c0_53 = arith.constant 0 : index
    %127 = vector.load %arg3[%c198, %c0_53] : memref<200x32xf32, #tpu.memory_space<vmem>>, vector<1x32xf32>
    %cst_54 = arith.constant dense<0.000000e+00> : vector<32xf32>
    %128 = vector.multi_reduction <add>, %125, %cst_54 [0] : vector<8x32xf32> to vector<32xf32>
    %129 = vector.shape_cast %128 : vector<32xf32> to vector<1x32xf32>
    %130 = arith.mulf %125, %125 : vector<8x32xf32>
    %cst_55 = arith.constant dense<0.000000e+00> : vector<32xf32>
    %131 = vector.multi_reduction <add>, %130, %cst_55 [0] : vector<8x32xf32> to vector<32xf32>
    %132 = vector.shape_cast %131 : vector<32xf32> to vector<1x32xf32>
    %cst_56 = arith.constant 1.250000e-01 : f32
    %133 = vector.broadcast %cst_56 : f32 to vector<1x32xf32>
    %134 = arith.mulf %129, %133 : vector<1x32xf32>
    %cst_57 = arith.constant 1.250000e-01 : f32
    %135 = vector.broadcast %cst_57 : f32 to vector<1x32xf32>
    %136 = arith.mulf %132, %135 : vector<1x32xf32>
    %137 = arith.mulf %134, %134 : vector<1x32xf32>
    %138 = arith.subf %136, %137 : vector<1x32xf32>
    %cst_58 = arith.constant 0.000000e+00 : f32
    %139 = vector.broadcast %cst_58 : f32 to vector<1x32xf32>
    %140 = arith.maximumf %138, %139 : vector<1x32xf32>
    %cst_59 = arith.constant 9.99999974E-6 : f32
    %141 = vector.broadcast %cst_59 : f32 to vector<1x32xf32>
    %142 = arith.addf %140, %141 : vector<1x32xf32>
    %143 = math.rsqrt %142 : vector<1x32xf32>
    %144 = arith.mulf %126, %143 : vector<1x32xf32>
    %145 = arith.mulf %134, %144 : vector<1x32xf32>
    %146 = arith.subf %127, %145 : vector<1x32xf32>
    %147 = vector.broadcast %144 : vector<1x32xf32> to vector<8x32xf32>
    %148 = arith.mulf %125, %147 : vector<8x32xf32>
    %149 = vector.broadcast %146 : vector<1x32xf32> to vector<8x32xf32>
    %150 = arith.addf %148, %149 : vector<8x32xf32>
    %151 = arith.addf %150, %88 : vector<8x32xf32>
    %cst_60 = arith.constant 0.000000e+00 : f32
    %152 = vector.broadcast %cst_60 : f32 to vector<8x32xf32>
    %153 = arith.maximumf %151, %152 : vector<8x32xf32>
    %c152_61 = arith.constant 152 : index
    %c16_62 = arith.constant 16 : index
    %154 = vector.load %arg3[%c152_61, %c16_62] : memref<200x32xf32, #tpu.memory_space<vmem>>, vector<32x16xf32>
    %c199 = arith.constant 199 : index
    %c0_63 = arith.constant 0 : index
    %155 = vector.load %arg3[%c199, %c0_63] : memref<200x32xf32, #tpu.memory_space<vmem>>, vector<1x16xf32>
    %cst_64 = arith.constant dense<0.000000e+00> : vector<8x16xf32>
    %156 = tpu.matmul %153, %154, %cst_64 {dimension_numbers = #tpu.dot_dimension_numbers<[1], [0], [0], [1], [0, 0, 1, 1], [], []>} : vector<8x32xf32>, vector<32x16xf32>, vector<8x16xf32> -> vector<8x16xf32>
    %157 = vector.broadcast %155 : vector<1x16xf32> to vector<8x16xf32>
    %158 = arith.addf %156, %157 : vector<8x16xf32>
    %c0_65 = arith.constant 0 : index
    %c0_66 = arith.constant 0 : index
    %159 = vector.load %arg4[%c0_65, %c0_66] : memref<8x32xf32, #tpu.memory_space<vmem>>, vector<8x16xf32>
    tpu.vector_store %arg4[%c0_65, %c0_66], %158 {strides = array<i32>} : memref<8x32xf32, #tpu.memory_space<vmem>>, vector<8x16xf32>,
    %c0_67 = arith.constant 0 : index
    %c16_68 = arith.constant 16 : index
    %160 = vector.load %arg4[%c0_67, %c16_68] : memref<8x32xf32, #tpu.memory_space<vmem>>, vector<8x16xf32>
    tpu.vector_store %arg4[%c0_67, %c16_68], %76 {strides = array<i32>} : memref<8x32xf32, #tpu.memory_space<vmem>>, vector<8x16xf32>,
    return
  }
  func.func @transform_0(%arg0: i32) -> (i32, i32) {
    %c0_i32 = arith.constant 0 : i32
    %c0_i32_0 = arith.constant 0 : i32
    return %arg0, %c0_i32 : i32, i32
  }
  func.func @transform_1(%arg0: i32) -> (i32, i32) {
    %c0_i32 = arith.constant 0 : i32
    %c0_i32_0 = arith.constant 0 : i32
    return %arg0, %c0_i32 : i32, i32
  }
  func.func @transform_2(%arg0: i32) -> (i32, i32) {
    %c0_i32 = arith.constant 0 : i32
    %c0_i32_0 = arith.constant 0 : i32
    %c0_i32_1 = arith.constant 0 : i32
    return %c0_i32, %c0_i32_0 : i32, i32
  }
  func.func @transform_3(%arg0: i32) -> (i32, i32) {
    %c0_i32 = arith.constant 0 : i32
    %c0_i32_0 = arith.constant 0 : i32
    return %arg0, %c0_i32 : i32, i32
  }
}

</mosaic_0001>

<bundles_post_ra>
// kernel: tpu_custom_call.1
= control target key start
LH: loop header
LB: loop body
LE: loop exit
PB: predicated region body
PF: predicated region fallthrough
CT: control target
= control target key end

     0   :  { %vm21_vm0 = vcmask 130048   ;;  %s699_s0 = inlined_call_operand.vmem [shape: f32[8,16], index: 0, kind: input, shape index: {}]   ;;  %s700_s1 = inlined_call_operand.vmem [shape: f32[8,8], index: 1, kind: input, shape index: {}]   ;;  %s701_s2 = inlined_call_operand.vmem [shape: f32[200,32], index: 2, kind: input, shape index: {}]   ;;  %s702_s3 = inlined_call_operand.hbm [shape: f32[8,32], index: 3, kind: output, shape index: {}]  }
   0x1   :  { %v18_v0 = vld [vmem:[%s701_s2 + $0x8] sm:$0xff]  ;;  %v17_v1 = vld [vmem:[%s701_s2] sm:$0xff] }
   0x2   :  { %v15_v2 = vld [vmem:[%s699_s0] sm:$0xff]  ;;  %39 = vmatpush.msra.mxu0 %v18_v0  ;;  %v48_v3 = vld [vmem:[%s701_s2 + $0x28] sm:$0xff] }
   0x3   :  { %v47_v4 = vld [vmem:[%s701_s2 + $0x20] sm:$0xff]  ;;  %67 = vmatpush.msra.mxu1 %v48_v3 }
   0x4   :  { %40 = vmatpush.msra.mxu0 %v17_v1 }
   0x5   :  { %457 = vmatmul.msk.f32.vlgmr.msra.gmra.mxu0 %vm21_vm0, %v15_v2  ;;  %68 = vmatpush.msra.mxu1 %v47_v4 }
   0x6   :  { %8 = vsyncpa [#allocation3], 0  ;;  %v46_v5 = vld [vmem:[%s701_s2 + $0x18] sm:$0xff]  ;;  %v45_v6 = vld [vmem:[%s701_s2 + $0x10] sm:$0xff]  ;;  %vm51_vm1 = vcmask 261120   ;;  %s523_s0 = smov 112  }
   0x7   :  { %69 = vmatpush.msra.mxu1 %v46_v5  ;;  %v479_v7 = vld [vmem:[%s701_s2 + $0xb8] ss:$0 sm:$0xff]  ;;  %v480_v10 = vld [vmem:[%s701_s2 + $0xb9] ss:$0 sm:$0xff]  ;;  %v119_v29 = vld [vmem:[%s701_s2 + $0x48] sm:$0xff]  ;;  %s524_s30 = smov 16  }
   0x8   :  { %v118_v30 = vld [vmem:[%s701_s2 + $0x40] sm:$0xff]  ;;  %137 = vmatpush.msra.mxu2 %v119_v29  ;;  %v117_v33 = vld [vmem:[%s701_s2 + $0x38] sm:$0xff]  ;;  %v116_v35 = vld [vmem:[%s701_s2 + $0x30] sm:$0xff]  ;;  %s525_s4 = smov 120   ;;  %vm228_vm8 = vcmask 64512   ;;  %s526_s12 = smov [#allocation2]  }
   0x9   :  { %70 = vmatpush.msra.mxu1 %v45_v6  ;;  %v75_v43 = vld [vmem:[%s701_s2 + $0xba] sm:$0x1]  ;;  %v76_v47 = vld [vmem:[%s701_s2 + $0xbb] sm:$0x1]  ;;  %v481_v55 = vld [vmem:[%s701_s2 + $0xbc] ss:$0 sm:$0xff] }
   0xa   :  { %138 = vmatpush.msra.mxu2 %v118_v30  ;;  %s446_s13 = sshll.u32 %s526_s12, 4  ;;  %s448_s16 = sshll.u32 %s702_s3, 4  ;;  %vm439_vm15 = vcmask 261248   ;;  %s447_s13 = int_to_ptr.vmem [resolvable:$true] %s446_s13  ;;  %s449_s16 = int_to_ptr.hbm [resolvable:$true] %s448_s16 }
   0xc   :  { %139 = vmatpush.msra.mxu2 %v117_v33 }
   0xe   :  { %140 = vmatpush.msra.mxu2 %v116_v35 }
  0x82   :  { %v42_v8 = vpop.f32.mrf.mxu0 }
  0x83   :  { %v572_v9 = vadd.f32 %v479_v7, %v42_v8 }
  0x85   :  { %458 = vmatmul.msk.f32.vlgmr.msra.gmra.mxu1 %vm51_vm1, %v572_v9 }
 0x102   :  { %v72_v11 = vpop.f32.mrf.mxu1 }
 0x103   :  { %v73_v12 = vadd.f32 %v480_v10, %v72_v11  ;;  %v190_v11 = vld [vmem:[%s701_s2 + $0xb0] sm:$0xff] }
 0x104   :  { %208 = vmatpush.msra.mxu3 %v190_v11 }
 0x105   :  { %v77_v13 = vsel %vm51_vm1, %v73_v12, 0.0  ;;  %v84_v14 = vmul.f32 %v73_v12, %v73_v12 }
 0x106   :  { %v78_v15 = vrot.slane %v77_v13, 4 }
 0x107   :  { %v85_v16 = vsel %vm51_vm1, %v84_v14, 0.0 }
 0x108   :  { %v79_v17 = vadd.f32 %v78_v15, %v77_v13  ;;  %v86_v18 = vrot.slane %v85_v16, 4 }
 0x10a   :  { %v80_v19 = vrot.slane %v79_v17, 2  ;;  %v87_v20 = vadd.f32 %v86_v18, %v85_v16  ;;  %v188_v16 = vld [vmem:[%s701_s2 + $0xa0] sm:$0xff]  ;;  %v187_v18 = vld [vmem:[%s701_s2 + $0x98] sm:$0xff] }
 0x10c   :  { %v81_v21 = vadd.f32 %v80_v19, %v79_v17  ;;  %v88_v22 = vrot.slane %v87_v20, 2 }
 0x10e   :  { %v82_v23 = vrot.slane %v81_v21, 1  ;;  %v89_v24 = vadd.f32 %v88_v22, %v87_v20 }
 0x110   :  { %v83_v25 = vadd.f32 %v82_v23, %v81_v21  ;;  %v90_v26 = vrot.slane %v89_v24, 1  ;;  %v474_v21 = vpack.i.bf16 %v187_v18, %v188_v16 }
 0x112   :  { %v91_v27 = vadd.f32 %v90_v26, %v89_v24  ;;  %v92_v28 = vmul.f32 0.125, %v83_v25  ;;  %475 = vrot.lane.b32.xlu1 %v474_v21, %s523_s0 }
 0x114   :  { %v93_v31 = vmul.f32 0.125, %v91_v27  ;;  %v94_v32 = vmul.f32 %v92_v28, %v92_v28  ;;  %v145_v27 = vld [vmem:[%s701_s2 + $0xbd] sm:$0x1] }
 0x116   :  { %v95_v34 = vsub.f32 %v93_v31, %v94_v32  ;;  %v146_v31 = vld [vmem:[%s701_s2 + $0xbe] sm:$0x1] }
 0x118   :  { %v96_v36 = vmax.f32 %v95_v34, 0.0 }
 0x11a   :  { %v97_v37 = vadd.f32 1e-05, %v96_v36 }
 0x11c   :  { %487 = vrsqrt.f32 %v97_v37  ;;  %vm104_vm3 = vweird.f32 %v97_v37 }
 0x122   :  { %v488_v38 = vpop.eup %487 }
 0x123   :  { %v99_v39 = vmul.f32 %v488_v38, %v97_v37  ;;  %vm105_vm2 = vweird.f32 %v488_v38 }
 0x124   :  { %vm106_vm4 = vmor %vm104_vm3, %vm105_vm2 }
 0x125   :  { %v100_v40 = vmul.f32 %v488_v38, %v99_v39 }
 0x127   :  { %v101_v41 = vmul.f32 0.5, %v100_v40  ;;  %v482_v40 = vld [vmem:[%s701_s2 + $0xbf] ss:$0 sm:$0xff] }
 0x129   :  { %v102_v42 = vsub.f32 1.5, %v101_v41 }
 0x12b   :  { %v103_v44 = vmul.f32 %v488_v38, %v102_v42 }
 0x12d   :  { %v107_v45 = vsel %vm106_vm4, %v488_v38, %v103_v44 }
 0x12e   :  { %v108_v46 = vmul.f32 %v107_v45, %v75_v43 }
 0x130   :  { %v111_v48 = vperm.slane %v108_v46, 0  ;;  %v109_v49 = vmul.f32 %v108_v46, %v92_v28  ;;  %v255_v46 = vld [vmem:[%s701_s2 + $0x70] sm:$0xff] }
 0x131   :  { %273 = vmatpush.msrb.mxu1 %v255_v46 }
 0x132   :  { %v110_v50 = vsub.f32 %v76_v47, %v109_v49  ;;  %v112_v51 = vmul.f32 %v111_v48, %v73_v12  ;;  %v189_v12 = vld [vmem:[%s701_s2 + $0xa8] sm:$0xff]  ;;  %v253_v48 = vld [vmem:[%s701_s2 + $0x60] sm:$0xff] }
 0x133   :  { %v469_v13 = vpack.i.bf16 %v189_v12, %v190_v11  ;;  %209 = vmatpush.msra.mxu3 %v189_v12  ;;  %v254_v47 = vld [vmem:[%s701_s2 + $0x68] sm:$0xff]  ;;  %v16_v49 = vld [vmem:[%s700_s1] sm:$0xff] }
 0x134   :  { %v113_v52 = vperm.slane %v110_v50, 0  ;;  %274 = vmatpush.msrb.mxu1 %v254_v47 }
 0x135   :  { %210 = vmatpush.msra.mxu3 %v188_v16  ;;  %v324_v16 = vld [vmem:[%s701_s2 + $0x88] sm:$0xff] }
 0x136   :  { %v114_v53 = vadd.f32 %v113_v52, %v112_v51  ;;  %275 = vmatpush.msrb.mxu1 %v253_v48 }
 0x137   :  { %211 = vmatpush.msra.mxu3 %v187_v18  ;;  %v323_v18 = vld [vmem:[%s701_s2 + $0x80] sm:$0xff] }
 0x138   :  { %v115_v54 = vmax.f32 %v114_v53, 0.0  ;;  %v252_v53 = vld [vmem:[%s701_s2 + $0x58] sm:$0xff] }
 0x139   :  { %276 = vmatpush.msrb.mxu1 %v252_v53 }
 0x13a   :  { %459 = vmatmul.msk.f32.vlgmr.msra.gmra.mxu2 %vm51_vm1, %v115_v54  ;;  %v483_v54 = vld [vmem:[%s701_s2 + $0xc0] ss:$0 sm:$0xff] }
 0x1bd   :  { %v142_v56 = vpop.f32.mrf.mxu2 }
 0x1be   :  { %v143_v57 = vadd.f32 %v481_v55, %v142_v56 }
 0x1c0   :  { %v147_v58 = vsel %vm51_vm1, %v143_v57, 0.0  ;;  %v154_v59 = vmul.f32 %v143_v57, %v143_v57 }
 0x1c1   :  { %v148_v60 = vrot.slane %v147_v58, 4 }
 0x1c2   :  { %v155_v61 = vsel %vm51_vm1, %v154_v59, 0.0 }
 0x1c3   :  { %v149_v62 = vadd.f32 %v148_v60, %v147_v58  ;;  %v156_v63 = vrot.slane %v155_v61, 4 }
 0x1c5   :  { %v150_v0 = vrot.slane %v149_v62, 2  ;;  %v157_v1 = vadd.f32 %v156_v63, %v155_v61 }
 0x1c7   :  { %v151_v2 = vadd.f32 %v150_v0, %v149_v62  ;;  %v158_v3 = vrot.slane %v157_v1, 2 }
 0x1c9   :  { %v152_v4 = vrot.slane %v151_v2, 1  ;;  %v159_v5 = vadd.f32 %v158_v3, %v157_v1 }
 0x1cb   :  { %v153_v6 = vadd.f32 %v152_v4, %v151_v2  ;;  %v160_v7 = vrot.slane %v159_v5, 1 }
 0x1cd   :  { %v161_v8 = vadd.f32 %v160_v7, %v159_v5  ;;  %v162_v10 = vmul.f32 0.125, %v153_v6 }
 0x1cf   :  { %v163_v14 = vmul.f32 0.125, %v161_v8  ;;  %v164_v15 = vmul.f32 %v162_v10, %v162_v10 }
 0x1d1   :  { %v165_v17 = vsub.f32 %v163_v14, %v164_v15 }
 0x1d3   :  { %v166_v19 = vmax.f32 %v165_v17, 0.0 }
 0x1d5   :  { %v167_v20 = vadd.f32 1e-05, %v166_v19  ;;  %v322_v19 = vld [vmem:[%s701_s2 + $0x78] sm:$0xff] }
 0x1d7   :  { %489 = vrsqrt.f32 %v167_v20  ;;  %vm174_vm6 = vweird.f32 %v167_v20 }
 0x1dd   :  { %v490_v22 = vpop.eup %489 }
 0x1de   :  { %v169_v23 = vmul.f32 %v490_v22, %v167_v20  ;;  %vm175_vm5 = vweird.f32 %v490_v22 }
 0x1df   :  { %vm176_vm7 = vmor %vm174_vm6, %vm175_vm5 }
 0x1e0   :  { %v170_v24 = vmul.f32 %v490_v22, %v169_v23 }
 0x1e2   :  { %v171_v25 = vmul.f32 0.5, %v170_v24 }
 0x1e4   :  { %v172_v26 = vsub.f32 1.5, %v171_v25 }
 0x1e6   :  { %v173_v28 = vmul.f32 %v490_v22, %v172_v26 }
 0x1e8   :  { %v177_v29 = vsel %vm176_vm7, %v490_v22, %v173_v28 }
 0x1e9   :  { %v178_v30 = vmul.f32 %v177_v29, %v145_v27  ;;  %v281_v27 = vld [vmem:[%s701_s2 + $0xc2] sm:$0x1] }
 0x1eb   :  { %v181_v32 = vperm.slane %v178_v30, 0  ;;  %v179_v33 = vmul.f32 %v178_v30, %v162_v10 }
 0x1ed   :  { %v180_v34 = vsub.f32 %v146_v31, %v179_v33  ;;  %v182_v35 = vmul.f32 %v181_v32, %v143_v57  ;;  %v484_v57 = vld [vmem:[%s701_s2 + $0xc1] ss:$0 sm:$0xff]  ;;  %v282_v31 = vld [vmem:[%s701_s2 + $0xc3] sm:$0x1] }
 0x1ef   :  { %v183_v36 = vperm.slane %v180_v34, 0 }
 0x1f1   :  { %v184_v37 = vadd.f32 %v183_v36, %v182_v35 }
 0x1f3   :  { %v185_v38 = vadd.f32 %v184_v37, %v572_v9  ;;  %v225_v9 = vld [vmem:[%s701_s2 + $0x50] sm:$0xff] }
 0x1f4   :  { %247 = vmatpush.msrb.mxu0 %v225_v9 }
 0x1f5   :  { %v186_v39 = vmax.f32 %v185_v38, 0.0 }
 0x1f7   :  { %460 = vmatmul.msk.f32.vlgmr.msra.gmra.mxu3 %vm51_vm1, %v186_v39  ;;  %v485_v39 = vld [vmem:[%s701_s2 + $0xc4] ss:$0 sm:$0xff] }
 0x27a   :  { %v213_v41 = vpop.f32.mrf.mxu3 }
 0x27b   :  { %v214_v42 = vadd.f32 %v482_v40, %v213_v41 }
 0x27d   :  { %v216_v43 = vmul.f32 0.5, %v214_v42  ;;  %436 = vrot.lane.b32.xlu1 %v214_v42, %s524_s30 }
 0x27f   :  { %v217_v44 = vmul.f32 1.442695, %v216_v43 }
 0x281   :  { %491 = vpow2.f32 %v217_v44 }
 0x287   :  { %v492_v45 = vpop.eup %491 }
 0x288   :  { %220 = vrot.lane.b32.xlu0 %v492_v45, %s525_s4 }
 0x290   :  { %470 = vrot.lane.b32.xlu0 %v469_v13, %s523_s0  ;;  %v325_v13 = vld [vmem:[%s701_s2 + $0x90] sm:$0xff] }
 0x291   :  { %343 = vmatpush.msrb.mxu2 %v325_v13 }
 0x293   :  { %344 = vmatpush.msrb.mxu2 %v324_v16 }
 0x295   :  { %345 = vmatpush.msrb.mxu2 %v323_v18 }
 0x297   :  { %346 = vmatpush.msrb.mxu2 %v322_v19 }
 0x2fa   :  { %v221_v50 = vpop.permute.xlu0 %220 }
 0x2fb   :  { %v223_v51 = vmul.f32 %v221_v50, %v16_v49 }
 0x2fd   :  { %v224_v52 = vadd.f32 %v223_v51, %v214_v42 }
 0x2ff   :  { %461 = vmatmul.msk.f32.vlgmr.msrb.gmra.mxu0 %vm228_vm8, %v224_v52 }
 0x37c   :  { %v249_v55 = vpop.f32.mrf.mxu0 }
 0x37d   :  { %v651_v56 = vadd.f32 %v483_v54, %v249_v55  ;;  %v471_v55 = vpop.permute.xlu0 %470 }
 0x37f   :  { %462 = vmatmul.msk.f32.vlgmr.msrb.gmra.mxu1 %vm51_vm1, %v651_v56 }
 0x3fc   :  { %v278_v58 = vpop.f32.mrf.mxu1 }
 0x3fd   :  { %v279_v59 = vadd.f32 %v484_v57, %v278_v58  ;;  %v472_v57 = vunpack.i.l.bf16 %v471_v55 }
 0x3ff   :  { %v283_v60 = vsel %vm51_vm1, %v279_v59, 0.0  ;;  %v290_v61 = vmul.f32 %v279_v59, %v279_v59  ;;  %426 = vmatpush.msrb.mxu3 %v472_v57 }
 0x400   :  { %v284_v62 = vrot.slane %v283_v60, 4 }
 0x401   :  { %v291_v63 = vsel %vm51_vm1, %v290_v61, 0.0  ;;  %v476_v61 = vpop.permute.xlu1 %475 }
 0x402   :  { %v285_v0 = vadd.f32 %v284_v62, %v283_v60  ;;  %v292_v1 = vrot.slane %v291_v63, 4  ;;  %v473_v60 = vunpack.i.h.bf16 %v471_v55 }
 0x404   :  { %v286_v2 = vrot.slane %v285_v0, 2  ;;  %v293_v3 = vadd.f32 %v292_v1, %v291_v63  ;;  %427 = vmatpush.msrb.mxu3 %v473_v60 }
 0x406   :  { %v287_v4 = vadd.f32 %v286_v2, %v285_v0  ;;  %v294_v5 = vrot.slane %v293_v3, 2  ;;  %v477_v0 = vunpack.i.l.bf16 %v476_v61  ;;  %v478_v2 = vunpack.i.h.bf16 %v476_v61 }
 0x408   :  { %v288_v6 = vrot.slane %v287_v4, 1  ;;  %v295_v7 = vadd.f32 %v294_v5, %v293_v3  ;;  %428 = vmatpush.msrb.mxu3 %v477_v0 }
 0x40a   :  { %v289_v8 = vadd.f32 %v288_v6, %v287_v4  ;;  %v296_v10 = vrot.slane %v295_v7, 1  ;;  %429 = vmatpush.msrb.mxu3 %v478_v2 }
 0x40c   :  { %v297_v11 = vadd.f32 %v296_v10, %v295_v7  ;;  %v298_v12 = vmul.f32 0.125, %v289_v8 }
 0x40e   :  { %v299_v14 = vmul.f32 0.125, %v297_v11  ;;  %v300_v15 = vmul.f32 %v298_v12, %v298_v12  ;;  %v351_v11 = vld [vmem:[%s701_s2 + $0xc5] sm:$0x1] }
 0x410   :  { %v301_v17 = vsub.f32 %v299_v14, %v300_v15  ;;  %v352_v15 = vld [vmem:[%s701_s2 + $0xc6] sm:$0x1] }
 0x412   :  { %v302_v20 = vmax.f32 %v301_v17, 0.0 }
 0x414   :  { %v303_v21 = vadd.f32 1e-05, %v302_v20 }
 0x416   :  { %493 = vrsqrt.f32 %v303_v21  ;;  %vm310_vm10 = vweird.f32 %v303_v21 }
 0x41c   :  { %v494_v22 = vpop.eup %493 }
 0x41d   :  { %v305_v23 = vmul.f32 %v494_v22, %v303_v21  ;;  %vm311_vm9 = vweird.f32 %v494_v22 }
 0x41e   :  { %vm312_vm11 = vmor %vm310_vm10, %vm311_vm9 }
 0x41f   :  { %v306_v24 = vmul.f32 %v494_v22, %v305_v23 }
 0x421   :  { %v307_v25 = vmul.f32 0.5, %v306_v24  ;;  %v486_v24 = vld [vmem:[%s701_s2 + $0xc7] ss:$0 sm:$0xff] }
 0x423   :  { %v308_v26 = vsub.f32 1.5, %v307_v25 }
 0x425   :  { %v309_v28 = vmul.f32 %v494_v22, %v308_v26 }
 0x427   :  { %v313_v29 = vsel %vm312_vm11, %v494_v22, %v309_v28 }
 0x428   :  { %v314_v30 = vmul.f32 %v313_v29, %v281_v27  ;;  %v437_v27 = vpop.permute.xlu1 %436 }
 0x42a   :  { %v315_v32 = vmul.f32 %v314_v30, %v298_v12  ;;  %v317_v33 = vperm.slane %v314_v30, 0 }
 0x42c   :  { %v316_v34 = vsub.f32 %v282_v31, %v315_v32  ;;  %v318_v35 = vmul.f32 %v317_v33, %v279_v59 }
 0x42e   :  { %v319_v36 = vperm.slane %v316_v34, 0 }
 0x430   :  { %v320_v37 = vadd.f32 %v319_v36, %v318_v35 }
 0x432   :  { %v321_v38 = vmax.f32 %v320_v37, 0.0 }
 0x434   :  { %463 = vmatmul.msk.f32.vlgmr.msrb.gmra.mxu2 %vm51_vm1, %v321_v38 }
 0x4b7   :  { %v348_v40 = vpop.f32.mrf.mxu2 }
 0x4b8   :  { %v349_v41 = vadd.f32 %v485_v39, %v348_v40 }
 0x4ba   :  { %v353_v42 = vsel %vm51_vm1, %v349_v41, 0.0  ;;  %v360_v43 = vmul.f32 %v349_v41, %v349_v41 }
 0x4bb   :  { %v354_v44 = vrot.slane %v353_v42, 4 }
 0x4bc   :  { %v361_v45 = vsel %vm51_vm1, %v360_v43, 0.0 }
 0x4bd   :  { %v355_v9 = vadd.f32 %v354_v44, %v353_v42  ;;  %v362_v46 = vrot.slane %v361_v45, 4 }
 0x4bf   :  { %v356_v47 = vrot.slane %v355_v9, 2  ;;  %v363_v48 = vadd.f32 %v362_v46, %v361_v45 }
 0x4c1   :  { %v357_v49 = vadd.f32 %v356_v47, %v355_v9  ;;  %v364_v50 = vrot.slane %v363_v48, 2 }
 0x4c3   :  { %v358_v51 = vrot.slane %v357_v49, 1  ;;  %v365_v52 = vadd.f32 %v364_v50, %v363_v48 }
 0x4c5   :  { %v359_v53 = vadd.f32 %v358_v51, %v357_v49  ;;  %v366_v54 = vrot.slane %v365_v52, 1 }
 0x4c7   :  { %v367_v58 = vadd.f32 %v366_v54, %v365_v52  ;;  %v368_v59 = vmul.f32 0.125, %v359_v53 }
 0x4c9   :  { %v369_v62 = vmul.f32 0.125, %v367_v58  ;;  %v370_v63 = vmul.f32 %v368_v59, %v368_v59 }
 0x4cb   :  { %v371_v1 = vsub.f32 %v369_v62, %v370_v63 }
 0x4cd   :  { %v372_v3 = vmax.f32 %v371_v1, 0.0 }
 0x4cf   :  { %v373_v4 = vadd.f32 1e-05, %v372_v3 }
 0x4d1   :  { %495 = vrsqrt.f32 %v373_v4  ;;  %vm380_vm13 = vweird.f32 %v373_v4 }
 0x4d7   :  { %v496_v5 = vpop.eup %495 }
 0x4d8   :  { %v375_v6 = vmul.f32 %v496_v5, %v373_v4  ;;  %vm381_vm12 = vweird.f32 %v496_v5 }
 0x4d9   :  { %vm382_vm14 = vmor %vm380_vm13, %vm381_vm12 }
 0x4da   :  { %v376_v7 = vmul.f32 %v496_v5, %v375_v6 }
 0x4dc   :  { %v377_v8 = vmul.f32 0.5, %v376_v7 }
 0x4de   :  { %v378_v10 = vsub.f32 1.5, %v377_v8 }
 0x4e0   :  { %v379_v12 = vmul.f32 %v496_v5, %v378_v10 }
 0x4e2   :  { %v383_v13 = vsel %vm382_vm14, %v496_v5, %v379_v12 }
 0x4e3   :  { %v384_v14 = vmul.f32 %v383_v13, %v351_v11 }
 0x4e5   :  { %v385_v16 = vmul.f32 %v384_v14, %v368_v59  ;;  %v387_v17 = vperm.slane %v384_v14, 0 }
 0x4e7   :  { %v386_v18 = vsub.f32 %v352_v15, %v385_v16  ;;  %v388_v19 = vmul.f32 %v387_v17, %v349_v41 }
 0x4e9   :  { %v389_v20 = vperm.slane %v386_v18, 0 }
 0x4eb   :  { %v390_v21 = vadd.f32 %v389_v20, %v388_v19 }
 0x4ed   :  { %v391_v22 = vadd.f32 %v390_v21, %v651_v56 }
 0x4ef   :  { %v392_v23 = vmax.f32 %v391_v22, 0.0 }
 0x4f1   :  { %464 = vmatmul.msk.f32.vlgmr.msrb.gmra.mxu3 %vm51_vm1, %v392_v23 }
 0x574   :  { %v431_v25 = vpop.f32.mrf.mxu3 }
 0x575   :  { %v432_v26 = vadd.f32 %v486_v24, %v431_v25 }
 0x577   :  { %434 = vst.msk [vmem:[#allocation2] sm:$0xff] %vm21_vm0, %v432_v26 }
 0x578   :  { %440 = vst.msk [vmem:[#allocation2] sm:$0xff] %vm439_vm15, %v437_v27 }
 0x579   :  { %451 = dma.vmem_to_hbm [thread:$0]  %s447_s13, 128, %s449_s16, [#allocation3]  }
 0x57a   :  { %521 = dma.done.wait [#allocation3], 128  }
 0x57b   :  { %522 = vsyncadd [#allocation3], 4294967168 }
 0x57c   :  { %456 = vsyncpa [#allocation3], 1 }

</bundles_post_ra>
